<compile_context>
chip_gen: v6e
topology: v6e:2x2x1
jax: 0.10.0
libtpu: 0.0.40
codegen_flags: <defaults>
</compile_context>

<pallas_src>
import functools

import jax
import jax.numpy as jnp
from jax.experimental import pallas as pl
from jax.experimental.pallas import tpu as pltpu


def _round_up(a, b):
    return (a + b - 1) // b * b


def mlp_nl_kernel(x_ref, w1_ref, b1_ref, w2_ref, b2_ref, o_ref, *, nl,
                  compute_dtype):
    """Fused 2-layer 'input-dependent' MLP (eval-mode semantics).

    One batch tile per grid step.  One matmul per layer via the factored
    operand (x + nl*x^2).  Elementwise math in f32; operands cast to
    `compute_dtype` only at the MXU boundary; accumulation always f32.
    """
    xf = x_ref[...].astype(jnp.float32)              # (TB, in)
    # layer 1:  (x + nl*x^2) @ W1^T + b1   [== x@W1^T + nl*(x^2)@W1^T + b1]
    xq = xf + nl * (xf * xf)
    h = jnp.dot(xq.astype(compute_dtype), w1_ref[...],
                preferred_element_type=jnp.float32)
    h = jnp.maximum(h + b1_ref[...], 0.0)            # bias add + ReLU in f32

    # layer 2:  (h + nl*h^2) @ W2^T + b2
    hq = h + nl * (h * h)
    out = jnp.dot(hq.astype(compute_dtype), w2_ref[...],
                  preferred_element_type=jnp.float32)
    out = out + b2_ref[...]

    o_ref[...] = out.astype(o_ref.dtype)


def prepare_params(w1, b1, w2, b2, compute_dtype=None, lane=128):
    """One-time parameter prep (hoisted out of the per-call forward path).

    w1: (hidden, in)  PyTorch nn.Linear layout -> stored as (in, hidden_p)
    w2: (out, hidden)                          -> stored as (hidden_p, out_p)
    hidden/out are zero-padded up to multiples of `lane` (=128) so the kernel
    works on lane-dense vregs and issues unmasked output stores.  Biases stay
    float32 (added to the f32 accumulator).
    compute_dtype: dtype fed to the MXU (e.g. jnp.bfloat16 on v6e/v7x);
                   defaults to the weights' dtype (f32 -> exact numerics).
    """
    w1 = jnp.asarray(w1)
    w2 = jnp.asarray(w2)
    b1 = jnp.asarray(b1)
    b2 = jnp.asarray(b2)
    if compute_dtype is None:
        compute_dtype = w1.dtype

    hidden, in_features = w1.shape
    out_features = w2.shape[0]
    hid_p = _round_up(hidden, lane)
    out_p = _round_up(out_features, lane)

    w1t = jnp.zeros((in_features, hid_p), compute_dtype)
    w1t = w1t.at[:, :hidden].set(w1.T.astype(compute_dtype))     # (in, hid_p)
    w2t = jnp.zeros((hid_p, out_p), compute_dtype)
    w2t = w2t.at[:hidden, :out_features].set(w2.T.astype(compute_dtype))
    b1r = jnp.zeros((1, hid_p), jnp.float32)
    b1r = b1r.at[:, :hidden].set(b1.astype(jnp.float32).reshape(1, -1))
    b2r = jnp.zeros((1, out_p), jnp.float32)
    b2r = b2r.at[:, :out_features].set(b2.astype(jnp.float32).reshape(1, -1))
    return w1t, b1r, w2t, b2r, out_features


def _pick_tb(batch, per_row_bytes, block_batch, vmem_budget):
    """Largest batch tile (multiple of 8) fitting the VMEM budget & cap."""
    tb_budget = max(8, (vmem_budget // max(per_row_bytes, 1)) // 8 * 8)
    tb = min(block_batch, tb_budget)
    if tb >= batch:
        return batch        # single block == full dim (always legal)
    return max(8, tb // 8 * 8)


def model_forward(x, params, nl, *, block_batch=2048,
                  vmem_budget=16 * 1024 * 1024):
    """JAX wrapper mirroring Model.forward (eval mode).

    x      : any shape whose trailing elements flatten to (-1, in_features)
    params : output of prepare_params() (pre-transposed, lane-padded weights)
    nl     : python float
    """
    w1t, b1r, w2t, b2r, out_features = params
    in_features, hid_p = w1t.shape
    out_p = w2t.shape[1]
    compute_dtype = w1t.dtype

    x2d = x.reshape(-1, in_features)                 # x.view(-1, in_features)
    out_dtype = x2d.dtype
    batch = x2d.shape[0]

    # Per-row VMEM bytes: double-buffered x & out tiles + f32 intermediates.
    per_row = (2 * in_features * x2d.dtype.itemsize
               + 2 * out_p * jnp.dtype(out_dtype).itemsize
               + 4 * (hid_p + out_p) * 4)
    tb = _pick_tb(batch, per_row, block_batch, vmem_budget)
    grid = (pl.cdiv(batch, tb),)                     # ragged last block OK

    kernel = functools.partial(mlp_nl_kernel, nl=float(nl),
                               compute_dtype=compute_dtype)

    # Advisory cost hint for the surrounding XLA schedule.
    flops = 2 * batch * (in_features * hid_p + hid_p * out_p) \
        + 4 * batch * (in_features + hid_p)
    bytes_accessed = (x2d.size * x2d.dtype.itemsize
                      + w1t.size * w1t.dtype.itemsize
                      + w2t.size * w2t.dtype.itemsize
                      + (b1r.size + b2r.size) * 4
                      + batch * out_p * jnp.dtype(out_dtype).itemsize)

    out = pl.pallas_call(
        kernel,
        out_shape=jax.ShapeDtypeStruct((batch, out_p), out_dtype),
        grid=grid,
        in_specs=[
            pl.BlockSpec((tb, in_features), lambda i: (i, 0)),     # x tile
            pl.BlockSpec((in_features, hid_p), lambda i: (0, 0)),  # W1^T (resident)
            pl.BlockSpec((1, hid_p), lambda i: (0, 0)),            # b1
            pl.BlockSpec((hid_p, out_p), lambda i: (0, 0)),        # W2^T (resident)
            pl.BlockSpec((1, out_p), lambda i: (0, 0)),            # b2
        ],
        out_specs=pl.BlockSpec((tb, out_p), lambda i: (i, 0)),     # lane-dense
        compiler_params=pltpu.CompilerParams(
            dimension_semantics=("parallel",),
            vmem_limit_bytes=32 * 1024 * 1024,
        ),
        cost_estimate=pl.CostEstimate(
            flops=flops, transcendentals=0, bytes_accessed=bytes_accessed),
    )(x2d, w1t, b1r, w2t, b2r)

    # Strip the zero-padded output lanes (no-op slice if out_p == out_features).
    return out[:, :out_features]


def _reference_forward(x, w1, b1, w2, b2, nl):
    """Pure-JAX reference (mirrors the PyTorch eval-mode code path)."""
    in_features = w1.shape[1]
    x = x.reshape(-1, in_features)
    h = x @ w1.T + nl * (x ** 2) @ w1.T + b1
    h = jnp.maximum(h, 0.0)
    return h @ w2.T + nl * (h ** 2) @ w2.T + b2


if __name__ == "__main__":
    # Small, deterministic problem setup consistent with the module.
    in_features, hidden_features, out_features = 32, 64, 16
    nl = 0.1
    batch_shape = (2, 4)                            # x.view(-1, 32) -> (8, 32)

    key = jax.random.PRNGKey(0)
    kx, kw1, kb1, kw2, kb2 = jax.random.split(key, 5)

    # Deterministic "PyTorch-style" uniform(-1/sqrt(fan_in), 1/sqrt(fan_in)) init.
    bound1 = 1.0 / jnp.sqrt(jnp.float32(in_features))
    bound2 = 1.0 / jnp.sqrt(jnp.float32(hidden_features))
    w1 = jax.random.uniform(kw1, (hidden_features, in_features),
                            jnp.float32, -bound1, bound1)
    b1 = jax.random.uniform(kb1, (hidden_features,), jnp.float32, -bound1, bound1)
    w2 = jax.random.uniform(kw2, (out_features, hidden_features),
                            jnp.float32, -bound2, bound2)
    b2 = jax.random.uniform(kb2, (out_features,), jnp.float32, -bound2, bound2)

    x = jax.random.normal(kx, batch_shape + (in_features,), jnp.float32)

    # One-time param prep (transpose/lane-padding hoisted off the hot path).
    # For bf16 MXU operands on v6e/v7x: prepare_params(..., compute_dtype=jnp.bfloat16)
    params = prepare_params(w1, b1, w2, b2)

    out = model_forward(x, params, nl)
    out = jax.block_until_ready(out)

    ref = _reference_forward(x, w1, b1, w2, b2, nl)
    assert out.shape == (8, out_features), out.shape
    assert jnp.allclose(out, ref, atol=1e-5, rtol=1e-5), \
        float(jnp.max(jnp.abs(out - ref)))

    # TODO(synk): training-mode (plain Linear) branch of InputDependentLayer is
    # not implemented; this kernel covers the eval-mode quadratic+nl path only.

    print("KERNEL_OK")
</pallas_src>

<mosaic_0001>
module attributes {stable_mosaic.version = 11 : i64} {
  func.func @mlp_nl_kernel(%arg0: i32, %arg1: memref<8x32xf32, #tpu.memory_space<vmem>>, %arg2: memref<32x128xf32, #tpu.memory_space<vmem>>, %arg3: memref<1x128xf32, #tpu.memory_space<vmem>>, %arg4: memref<128x128xf32, #tpu.memory_space<vmem>>, %arg5: memref<1x128xf32, #tpu.memory_space<vmem>>, %arg6: memref<8x128xf32, #tpu.memory_space<vmem>>) attributes {dimension_semantics = [#tpu.dimension_semantics<parallel>], iteration_bounds = array<i64: 1>, scalar_prefetch = 0 : i64, scratch_operands = 0 : i64, tpu.core_type = #tpu.core_type<tc>, window_params = [{transform_indices = @transform_0, window_bounds = array<i64: 8, 32>}, {pipeline_mode = #tpu.pipeline_mode<synchronous>, transform_indices = @transform_1, window_bounds = array<i64: 32, 128>}, {pipeline_mode = #tpu.pipeline_mode<synchronous>, transform_indices = @transform_2, window_bounds = array<i64: 1, 128>}, {pipeline_mode = #tpu.pipeline_mode<synchronous>, transform_indices = @transform_3, window_bounds = array<i64: 128, 128>}, {pipeline_mode = #tpu.pipeline_mode<synchronous>, transform_indices = @transform_4, window_bounds = array<i64: 1, 128>}, {transform_indices = @transform_5, window_bounds = array<i64: 8, 128>}]} {
    %c0 = arith.constant 0 : index
    %c0_0 = arith.constant 0 : index
    %0 = vector.load %arg1[%c0, %c0_0] : memref<8x32xf32, #tpu.memory_space<vmem>>, vector<8x32xf32>
    %1 = arith.mulf %0, %0 : vector<8x32xf32>
    %cst = arith.constant 1.000000e-01 : f32
    %2 = vector.broadcast %cst : f32 to vector<8x32xf32>
    %3 = arith.mulf %2, %1 : vector<8x32xf32>
    %4 = arith.addf %0, %3 : vector<8x32xf32>
    %c0_1 = arith.constant 0 : index
    %c0_2 = arith.constant 0 : index
    %5 = vector.load %arg2[%c0_1, %c0_2] : memref<32x128xf32, #tpu.memory_space<vmem>>, vector<32x128xf32>
    %cst_3 = arith.constant dense<0.000000e+00> : vector<8x128xf32>
    %6 = tpu.matmul %4, %5, %cst_3 {dimension_numbers = #tpu.dot_dimension_numbers<[1], [0], [0], [1], [0, 0, 1, 1], [], []>} : vector<8x32xf32>, vector<32x128xf32>, vector<8x128xf32> -> vector<8x128xf32>
    %c0_4 = arith.constant 0 : index
    %c0_5 = arith.constant 0 : index
    %7 = vector.load %arg3[%c0_4, %c0_5] : memref<1x128xf32, #tpu.memory_space<vmem>>, vector<1x128xf32>
    %8 = vector.broadcast %7 : vector<1x128xf32> to vector<8x128xf32>
    %9 = arith.addf %6, %8 : vector<8x128xf32>
    %cst_6 = arith.constant 0.000000e+00 : f32
    %10 = vector.broadcast %cst_6 : f32 to vector<8x128xf32>
    %11 = arith.maximumf %9, %10 : vector<8x128xf32>
    %12 = arith.mulf %11, %11 : vector<8x128xf32>
    %cst_7 = arith.constant 1.000000e-01 : f32
    %13 = vector.broadcast %cst_7 : f32 to vector<8x128xf32>
    %14 = arith.mulf %13, %12 : vector<8x128xf32>
    %15 = arith.addf %11, %14 : vector<8x128xf32>
    %c0_8 = arith.constant 0 : index
    %c0_9 = arith.constant 0 : index
    %16 = vector.load %arg4[%c0_8, %c0_9] : memref<128x128xf32, #tpu.memory_space<vmem>>, vector<128x128xf32>
    %cst_10 = arith.constant dense<0.000000e+00> : vector<8x128xf32>
    %17 = tpu.matmul %15, %16, %cst_10 {dimension_numbers = #tpu.dot_dimension_numbers<[1], [0], [0], [1], [0, 0, 1, 1], [], []>} : vector<8x128xf32>, vector<128x128xf32>, vector<8x128xf32> -> vector<8x128xf32>
    %c0_11 = arith.constant 0 : index
    %c0_12 = arith.constant 0 : index
    %18 = vector.load %arg5[%c0_11, %c0_12] : memref<1x128xf32, #tpu.memory_space<vmem>>, vector<1x128xf32>
    %19 = vector.broadcast %18 : vector<1x128xf32> to vector<8x128xf32>
    %20 = arith.addf %17, %19 : vector<8x128xf32>
    %c0_13 = arith.constant 0 : index
    %c0_14 = arith.constant 0 : index
    %21 = vector.load %arg6[%c0_13, %c0_14] : memref<8x128xf32, #tpu.memory_space<vmem>>, vector<8x128xf32>
    tpu.vector_store %arg6[%c0_13, %c0_14], %20 {strides = array<i32>} : memref<8x128xf32, #tpu.memory_space<vmem>>, vector<8x128xf32>,
    return
  }
  func.func @transform_0(%arg0: i32) -> (i32, i32) {
    %c0_i32 = arith.constant 0 : i32
    %c0_i32_0 = arith.constant 0 : i32
    return %arg0, %c0_i32 : i32, i32
  }
  func.func @transform_1(%arg0: i32) -> (i32, i32) {
    %c0_i32 = arith.constant 0 : i32
    %c0_i32_0 = arith.constant 0 : i32
    %c0_i32_1 = arith.constant 0 : i32
    return %c0_i32, %c0_i32_0 : i32, i32
  }
  func.func @transform_2(%arg0: i32) -> (i32, i32) {
    %c0_i32 = arith.constant 0 : i32
    %c0_i32_0 = arith.constant 0 : i32
    %c0_i32_1 = arith.constant 0 : i32
    return %c0_i32, %c0_i32_0 : i32, i32
  }
  func.func @transform_3(%arg0: i32) -> (i32, i32) {
    %c0_i32 = arith.constant 0 : i32
    %c0_i32_0 = arith.constant 0 : i32
    %c0_i32_1 = arith.constant 0 : i32
    return %c0_i32, %c0_i32_0 : i32, i32
  }
  func.func @transform_4(%arg0: i32) -> (i32, i32) {
    %c0_i32 = arith.constant 0 : i32
    %c0_i32_0 = arith.constant 0 : i32
    %c0_i32_1 = arith.constant 0 : i32
    return %c0_i32, %c0_i32_0 : i32, i32
  }
  func.func @transform_5(%arg0: i32) -> (i32, i32) {
    %c0_i32 = arith.constant 0 : i32
    %c0_i32_0 = arith.constant 0 : i32
    return %arg0, %c0_i32 : i32, i32
  }
}

</mosaic_0001>

<bundles_post_ra>
// kernel: tpu_custom_call.1
= control target key start
LH: loop header
LB: loop body
LE: loop exit
PB: predicated region body
PF: predicated region fallthrough
CT: control target
= control target key end

     0   :  { %10 = vsyncpa [#allocation3], 0  ;;  %s506_s0 = inlined_call_operand.hbm [shape: f32[8,32], index: 0, kind: input, shape index: {}]   ;;  %s507_s1 = inlined_call_operand.hbm [shape: f32[32,128], index: 1, kind: input, shape index: {}]   ;;  %s508_s2 = inlined_call_operand.vmem [shape: f32[1,128], index: 2, kind: input, shape index: {}]   ;;  %s509_s3 = inlined_call_operand.hbm [shape: f32[128,128], index: 3, kind: input, shape index: {}]   ;;  %s510_s4 = inlined_call_operand.vmem [shape: f32[1,128], index: 4, kind: input, shape index: {}]   ;;  %s511_s5 = inlined_call_operand.hbm [shape: f32[8,128], index: 5, kind: output, shape index: {}]  }
   0x1   :  { %11 = vsyncpa [#allocation6], 0 }
   0x2   :  { %12 = vsyncpa [#allocation4], 0  ;;  %s428_s18 = smov [#allocation5]  }
   0x3   :  { %s28_s19 = sshll.u32 %s428_s18, 4  ;;  %s29_s19 = int_to_ptr.vmem [resolvable:$true] %s28_s19 }
   0x4   :  { %s350_s20 = scalar_lea.vmem %s29_s19, 512  ;;  %p355_p1 = scmp.lt.s32.totalorder %s29_s19, %s29_s19 }
   0x5   :  { %p351_p0 = scmp.ne.s32.totalorder %s29_s19, %s350_s20  ;;  %p356_p2 = scmp.lt.s32.totalorder %s350_s20, %s350_s20 }
   0x7   :  { %p357_p3 = por %p356_p2, %p355_p1 }
   0x9   :  { %p358_p4 = pnand %p357_p3, %p351_p0 }
   0xb   :  { %361 = shalt.err (!%p358_p4)
}
   0xc   :  { %s429_s21 = smov 128   ;;  %s430_s22 = smov 8  }
   0xd   :  { %34 = dma.hbm_to_vmem [thread:$0]  %s507_s1, 512, %s29_s19, [#allocation6], %s429_s21, %s429_s21, %s430_s22  }
   0xe   :  { %s431_s25 = smov [#allocation2]   ;;  %s432_s27 = smov [#allocation7]  }
   0xf   :  { %s19_s26 = sshll.u32 %s431_s25, 4  ;;  %s42_s28 = sshll.u32 %s432_s27, 4  ;;  %s20_s26 = int_to_ptr.vmem [resolvable:$true] %s19_s26  ;;  %s43_s28 = int_to_ptr.vmem [resolvable:$true] %s42_s28 }
  0x10   :  { %s370_s29 = scalar_lea.vmem %s20_s26, 128  ;;  %p375_p6 = scmp.lt.s32.totalorder %s20_s26, %s20_s26 }
  0x11   :  { %p371_p5 = scmp.ne.s32.totalorder %s20_s26, %s370_s29  ;;  %p376_p7 = scmp.lt.s32.totalorder %s370_s29, %s370_s29 }
  0x13   :  { %p377_p8 = por %p376_p7, %p375_p6 }
  0x15   :  { %p378_p9 = pnand %p377_p8, %p371_p5 }
  0x17   :  { %381 = shalt.err (!%p378_p9)
}
  0x18   :  { %22 = dma.hbm_to_vmem [thread:$0]  %s506_s0, 128, %s20_s26, [#allocation3]  }
  0x19   :  { %s390_s7 = scalar_lea.vmem %s43_s28, 2048  ;;  %p395_p11 = scmp.lt.s32.totalorder %s43_s28, %s43_s28 }
  0x1a   :  { %p391_p10 = scmp.ne.s32.totalorder %s43_s28, %s390_s7  ;;  %p396_p12 = scmp.lt.s32.totalorder %s390_s7, %s390_s7 }
  0x1c   :  { %p397_p13 = por %p396_p12, %p395_p11 }
  0x1e   :  { %p398_p0 = pnand %p397_p13, %p391_p10 }
  0x20   :  { %401 = shalt.err (!%p398_p0)
}
  0x21   :  { %48 = dma.hbm_to_vmem [thread:$0]  %s509_s3, 2048, %s43_s28, [#allocation6], %s429_s21, %s429_s21, %s430_s22  }
  0x22   :  { %422 = dma.done.wait [#allocation3], 128  }
  0x23   :  { %423 = vsyncadd [#allocation3], 4294967168 }
  0x24   :  { %424 = dma.done.wait [#allocation6], 2560  }
  0x25   :  { %425 = vsyncadd [#allocation6], 4294964736  ;;  %v433_v0 = vmov 0.0   ;;  %vm434_vm0 = vmmov 0   ;;  %v67_v1 = vld [vmem:[#allocation5 + $0x18] sm:$0xff]  ;;  %v66_v2 = vld [vmem:[#allocation5 + $0x10] sm:$0xff] }
  0x26   :  { %288 = vmatprep.subr.mxu0 %v433_v0  ;;  %296 = vmatprep.mubr.msk.f32.mxu0 %vm434_vm0, %v433_v0  ;;  %v60_v3 = vld [vmem:[#allocation2] sm:$0xff]  ;;  %v65_v5 = vld [vmem:[#allocation5 + $0x8] sm:$0xff]  ;;  %v167_v7 = vld [vmem:[#allocation7 + $0x70] sm:$0xff]  ;;  %vm75_vm1 = vcmask 261120   ;;  %s435_s11 = smov [#allocation8]  }
  0x27   :  { %299 = vmatprep.subr.mxu1 %v433_v0  ;;  %331 = vmatprep.mubr.msk.f32.mxu1 %vm434_vm0, %v433_v0  ;;  %v168_v4 = vld [vmem:[#allocation7 + $0x78] sm:$0xff]  ;;  %v61_v6 = vmul.f32 %v60_v3, %v60_v3  ;;  %v166_v8 = vld [vmem:[#allocation7 + $0x68] sm:$0xff]  ;;  %v64_v9 = vld [vmem:[#allocation5] sm:$0xff]  ;;  %s253_s12 = sshll.u32 %s435_s11, 4  ;;  %s254_s12 = int_to_ptr.vmem [resolvable:$true] %s253_s12 }
  0x28   :  { %289 = vmatpush3.msra.mxu0 %v67_v1  ;;  %300 = vmatpush3.msra.mxu1 %v168_v4  ;;  %v165_v11 = vld [vmem:[#allocation7 + $0x60] sm:$0xff]  ;;  %v164_v13 = vld [vmem:[#allocation7 + $0x58] sm:$0xff]  ;;  %v163_v14 = vld [vmem:[#allocation7 + $0x50] sm:$0xff]  ;;  %p407_p2 = scmp.lt.s32.totalorder %s254_s12, %s254_s12 }
  0x29   :  { %290 = vmatprep.subr.mxu0 %v433_v0  ;;  %301 = vmatprep.subr.mxu1 %v433_v0  ;;  %v62_v10 = vmul.f32 0.1, %v61_v6  ;;  %v162_v15 = vld [vmem:[#allocation7 + $0x48] sm:$0xff]  ;;  %v161_v16 = vld [vmem:[#allocation7 + $0x40] sm:$0xff]  ;;  %v160_v17 = vld [vmem:[#allocation7 + $0x38] sm:$0xff] }
  0x2a   :  { %291 = vmatpush3.msra.mxu0 %v66_v2  ;;  %302 = vmatpush3.msra.mxu1 %v167_v7  ;;  %v159_v18 = vld [vmem:[#allocation7 + $0x30] sm:$0xff]  ;;  %v158_v19 = vld [vmem:[#allocation7 + $0x28] sm:$0xff]  ;;  %v157_v20 = vld [vmem:[#allocation7 + $0x20] sm:$0xff] }
  0x2b   :  { %292 = vmatprep.subr.mxu0 %v433_v0  ;;  %303 = vmatprep.subr.mxu1 %v433_v0  ;;  %v63_v12 = vadd.f32 %v62_v10, %v60_v3  ;;  %v156_v21 = vld [vmem:[#allocation7 + $0x18] sm:$0xff]  ;;  %v155_v22 = vld [vmem:[#allocation7 + $0x10] sm:$0xff]  ;;  %v154_v23 = vld [vmem:[#allocation7 + $0x8] sm:$0xff] }
  0x2c   :  { %293 = vmatpush3.msra.mxu0 %v65_v5  ;;  %304 = vmatpush3.msra.mxu1 %v166_v8  ;;  %v153_v24 = vld [vmem:[#allocation7] sm:$0xff]  ;;  %v263_v25 = vld [vmem:[%s508_s2] ss:$0 sm:$0xff]  ;;  %s402_s2 = scalar_lea.vmem %s254_s12, 128 }
  0x2d   :  { %294 = vmatprep.subr.mxu0 %v433_v0  ;;  %305 = vmatprep.subr.mxu1 %v433_v0  ;;  %v265_v33 = vld [vmem:[%s510_s4] ss:$0 sm:$0xff]  ;;  %p403_p1 = scmp.ne.s32.totalorder %s254_s12, %s402_s2  ;;  %p408_p3 = scmp.lt.s32.totalorder %s402_s2, %s402_s2 }
  0x2e   :  { %295 = vmatpush3.msra.mxu0 %v64_v9  ;;  %306 = vmatpush3.msra.mxu1 %v165_v11 }
  0x2f   :  { %297 = vmatmul.mubr.msk.f32.vlgmr.msra.gmra.mxu0 %vm75_vm1, %v63_v12  ;;  %307 = vmatprep.subr.mxu1 %v433_v0  ;;  %p409_p4 = por %p408_p3, %p407_p2 }
  0x30   :  { %308 = vmatpush3.msra.mxu1 %v164_v13 }
  0x31   :  { %309 = vmatprep.subr.mxu1 %v433_v0  ;;  %p410_p5 = pnand %p409_p4, %p403_p1 }
  0x32   :  { %310 = vmatpush3.msra.mxu1 %v163_v14 }
  0x33   :  { %311 = vmatprep.subr.mxu1 %v433_v0 }
  0x34   :  { %312 = vmatpush3.msra.mxu1 %v162_v15 }
  0x35   :  { %313 = vmatprep.subr.mxu1 %v433_v0 }
  0x36   :  { %314 = vmatpush3.msra.mxu1 %v161_v16 }
  0x37   :  { %315 = vmatprep.subr.mxu1 %v433_v0 }
  0x38   :  { %316 = vmatpush3.msra.mxu1 %v160_v17 }
  0x39   :  { %317 = vmatprep.subr.mxu1 %v433_v0 }
  0x3a   :  { %318 = vmatpush3.msra.mxu1 %v159_v18 }
  0x3b   :  { %319 = vmatprep.subr.mxu1 %v433_v0 }
  0x3c   :  { %320 = vmatpush3.msra.mxu1 %v158_v19 }
  0x3d   :  { %321 = vmatprep.subr.mxu1 %v433_v0 }
  0x3e   :  { %322 = vmatpush3.msra.mxu1 %v157_v20 }
  0x3f   :  { %323 = vmatprep.subr.mxu1 %v433_v0 }
  0x40   :  { %324 = vmatpush3.msra.mxu1 %v156_v21 }
  0x41   :  { %325 = vmatprep.subr.mxu1 %v433_v0 }
  0x42   :  { %326 = vmatpush3.msra.mxu1 %v155_v22 }
  0x43   :  { %327 = vmatprep.subr.mxu1 %v433_v0 }
  0x44   :  { %328 = vmatpush3.msra.mxu1 %v154_v23 }
  0x45   :  { %329 = vmatprep.subr.mxu1 %v433_v0 }
  0x46   :  { %330 = vmatpush3.msra.mxu1 %v153_v24 }
  0xef   :  { %v145_v26 = vpop.f32.mrf.mxu0 }
  0xf0   :  { %v146_v27 = vadd.f32 %v263_v25, %v145_v26 }
  0xf1   :  { %v298_v28 = vpop.f32.mrf.mxu0 }
  0xf2   :  { %v149_v29 = vmax.f32 %v146_v27, 0.0 }
  0xf4   :  { %v150_v30 = vmul.f32 %v149_v29, %v149_v29 }
  0xf6   :  { %v151_v31 = vmul.f32 0.1, %v150_v30 }
  0xf8   :  { %v152_v32 = vadd.f32 %v151_v31, %v149_v29 }
  0xfa   :  { %332 = vmatmul.mubr.f32.vlgmr.msra.gmra.mxu1 %v152_v32 }
 0x1ba   :  { %v242_v34 = vpop.f32.mrf.mxu1 }
 0x1bb   :  { %v243_v35 = vadd.f32 %v265_v33, %v242_v34 }
 0x1bc   :  { %v333_v36 = vpop.f32.mrf.mxu1 }
 0x1bd   :  { %246 = vst [vmem:[#allocation8] sm:$0xff] %v243_v35 }
 0x1be   :  { %413 = shalt.err (!%p410_p5)
}
 0x1bf   :  { %256 = dma.vmem_to_hbm [thread:$0]  %s254_s12, 128, %s511_s5, [#allocation4]  }
 0x1c0   :  { %426 = dma.done.wait [#allocation4], 128  }
 0x1c1   :  { %427 = vsyncadd [#allocation4], 4294967168 }
 0x1c2   :  { %260 = vsyncpa [#allocation3], 1 }
 0x1c3   :  { %261 = vsyncpa [#allocation6], 1 }
 0x1c4   :  { %262 = vsyncpa [#allocation4], 1 }

</bundles_post_ra>
